<compile_context>
chip_gen: v7x
topology: tpu7x:2x2x1
jax: 0.10.0
libtpu: 0.0.40
codegen_flags: <defaults>
</compile_context>

<pallas_src>
import jax
import jax.numpy as jnp
from jax import lax
from jax.experimental import pallas as pl
from jax.experimental.pallas import tpu as pltpu


def _score_tile_kernel(off_ref, dfn_ref, s_ref):
    """One (TM, TN) tile of the score matrix.

    off_ref : (TM, dim) bf16  fused offense embeddings (team + conf)
    dfn_ref : (TN, dim) bf16  fused defense embeddings (team + conf)
    s_ref   : (TM, TN)  f32   output score tile
    """
    # (TM, K) x (TN, K) contraction on the last dims — no materialized
    # transpose, bf16 MXU inputs, f32 accumulation, lane-dense store.
    s_ref[...] = lax.dot_general(
        off_ref[...], dfn_ref[...],
        dimension_numbers=(((1,), (1,)), ((), ())),
        preferred_element_type=jnp.float32).astype(s_ref.dtype)


def _pick_tile(n_team):
    """Largest output tile in {1024, 512, 256, 128}.

    Capped at 1024 so the double-buffered f32 output tile (8 MiB) fits v5e's
    16 MiB default scoped VMEM; chosen no larger than half the (128-aligned)
    problem so both "parallel" grid axes have >= 2 points and both v7x
    TensorCores get work once the problem is big enough.
    """
    n128 = pl.cdiv(n_team, 128) * 128
    half = n128 // 2
    for tile in (1024, 512, 256):
        if tile <= half:
            return tile
    return 128


def bilinear_lvm_model(offense_team, defense_team, offense_conf, defense_conf,
                       team_conf, *, out_dtype=jnp.float32):
    """Concrete `model` for OffDefTeamConfLVM.

    Args:
      offense_team, defense_team: (n_team, dim) f32
      offense_conf, defense_conf: (n_conf, dim) f32
      team_conf: (n_team,) int mapping team -> conference
    Returns:
      (n_team, n_team) score matrix (f32 by default).
    """
    n_team, dim = offense_team.shape
    team_conf = team_conf.astype(jnp.int32)
    # NOTE: JAX gather clips out-of-range conf ids (PyTorch would raise).

    # --- One-shot prologue (plain XLA, fused by the compiler): ------------
    # conf gather + team+conf add in f32, then bf16 cast for the MXU.
    off_fused = (offense_team.astype(jnp.float32)
                 + jnp.take(offense_conf.astype(jnp.float32), team_conf, axis=0)
                 ).astype(jnp.bfloat16)
    dfn_fused = (defense_team.astype(jnp.float32)
                 + jnp.take(defense_conf.astype(jnp.float32), team_conf, axis=0)
                 ).astype(jnp.bfloat16)

    tile = _pick_tile(n_team)
    n_pad = pl.cdiv(n_team, tile) * tile
    if n_pad != n_team:
        pad = ((0, n_pad - n_team), (0, 0))
        off_fused = jnp.pad(off_fused, pad)   # padded rows are exact zeros
        dfn_fused = jnp.pad(dfn_fused, pad)

    grid = (n_pad // tile, n_pad // tile)

    out_itemsize = jnp.dtype(out_dtype).itemsize
    cost = pl.CostEstimate(
        flops=2 * n_pad * n_pad * dim,
        transcendentals=0,
        bytes_accessed=n_pad * n_pad * out_itemsize + 2 * n_pad * dim * 2)

    # double-buffered output tile + 2 inputs x 2 buffers + 1 MiB margin;
    # floor at 16 MiB (cheap), cap at 64 MiB (v7x physical VMEM per core).
    vmem_needed = (2 * tile * tile * out_itemsize + 4 * tile * dim * 2
                   + (1 << 20))
    vmem_limit = int(min(max(vmem_needed, 16 << 20), 64 << 20))

    scores = pl.pallas_call(
        _score_tile_kernel,
        out_shape=jax.ShapeDtypeStruct((n_pad, n_pad), out_dtype),
        grid=grid,
        in_specs=[
            pl.BlockSpec((tile, dim), lambda i, j: (i, 0)),   # fused offense rows
            pl.BlockSpec((tile, dim), lambda i, j: (j, 0)),   # fused defense rows
        ],
        out_specs=pl.BlockSpec((tile, tile), lambda i, j: (i, j)),
        compiler_params=pltpu.CompilerParams(
            dimension_semantics=("parallel", "parallel"),
            vmem_limit_bytes=vmem_limit),
        cost_estimate=cost,
    )(off_fused, dfn_fused)

    if n_pad != n_team:
        scores = scores[:n_team, :n_team]
    return scores


class OffDefTeamConfLVM:
    """JAX port of the PyTorch module (parameters + dispatch to `model`)."""

    def __init__(self, n_team, n_conf, dim, model, key):
        k0, k1, k2, k3 = jax.random.split(key, 4)
        # nn.Parameter(torch.randn(...)) -> standard-normal init.
        self.offense_team = jax.random.normal(k0, (n_team, dim), jnp.float32)
        self.defense_team = jax.random.normal(k1, (n_team, dim), jnp.float32)
        self.offense_conf = jax.random.normal(k2, (n_conf, dim), jnp.float32)
        self.defense_conf = jax.random.normal(k3, (n_conf, dim), jnp.float32)
        self.model = model

    def __call__(self, *args):
        return self.model(self.offense_team, self.defense_team,
                          self.offense_conf, self.defense_conf, *args)

    # TODO(synk): project() (SVD-based nearest-orthogonal projection) is an
    # offline parameter update with no clean Pallas equivalent; not part of
    # the forward pass.


if __name__ == "__main__":
    n_team, n_conf, dim = 16, 4, 32

    key = jax.random.PRNGKey(0)
    pkey, _ = jax.random.split(key)

    lvm = OffDefTeamConfLVM(n_team, n_conf, dim, bilinear_lvm_model, pkey)

    # each team assigned a conference (forward arg)
    team_conf = (jnp.arange(n_team) % n_conf).astype(jnp.int32)

    scores = jax.block_until_ready(lvm(team_conf))

    # Reference mirroring the kernel's numerics (f32 gather+add, bf16 matmul
    # inputs, f32 accumulation).
    off_ref = (lvm.offense_team + lvm.offense_conf[team_conf]).astype(jnp.bfloat16)
    dfn_ref = (lvm.defense_team + lvm.defense_conf[team_conf]).astype(jnp.bfloat16)
    ref = lax.dot_general(off_ref, dfn_ref,
                          dimension_numbers=(((1,), (1,)), ((), ())),
                          preferred_element_type=jnp.float32)

    # Pure-f32 reference (PyTorch semantics) — loose tolerance covers the
    # intentional bf16 rounding of the fused embeddings.
    ref32 = (lvm.offense_team + lvm.offense_conf[team_conf]) @ (
        lvm.defense_team + lvm.defense_conf[team_conf]).T

    assert scores.shape == (n_team, n_team)
    assert scores.dtype == jnp.float32
    assert jnp.allclose(scores, ref, atol=1e-3, rtol=1e-3)
    assert jnp.allclose(scores, ref32, atol=5e-1, rtol=5e-2)

    print("KERNEL_OK")
</pallas_src>

<mosaic_0001>
module attributes {stable_mosaic.version = 11 : i64} {
  func.func @_score_tile_kernel(%arg0: i32, %arg1: i32, %arg2: memref<128x32xbf16, #tpu.memory_space<vmem>>, %arg3: memref<128x32xbf16, #tpu.memory_space<vmem>>, %arg4: memref<128x128xf32, #tpu.memory_space<vmem>>) attributes {dimension_semantics = [#tpu.dimension_semantics<parallel>, #tpu.dimension_semantics<parallel>], iteration_bounds = array<i64: 1, 1>, scalar_prefetch = 0 : i64, scratch_operands = 0 : i64, tpu.core_type = #tpu.core_type<tc>, window_params = [{transform_indices = @transform_0, window_bounds = array<i64: 128, 32>}, {transform_indices = @transform_1, window_bounds = array<i64: 128, 32>}, {transform_indices = @transform_2, window_bounds = array<i64: 128, 128>}]} {
    %c0 = arith.constant 0 : index
    %c0_0 = arith.constant 0 : index
    %0 = vector.load %arg2[%c0, %c0_0] : memref<128x32xbf16, #tpu.memory_space<vmem>>, vector<128x32xbf16>
    %c0_1 = arith.constant 0 : index
    %c0_2 = arith.constant 0 : index
    %1 = vector.load %arg3[%c0_1, %c0_2] : memref<128x32xbf16, #tpu.memory_space<vmem>>, vector<128x32xbf16>
    %cst = arith.constant dense<0.000000e+00> : vector<128x128xf32>
    %2 = tpu.matmul %0, %1, %cst {dimension_numbers = #tpu.dot_dimension_numbers<[1], [1], [0], [0], [0, 0, 1, 0], [], []>} : vector<128x32xbf16>, vector<128x32xbf16>, vector<128x128xf32> -> vector<128x128xf32>
    %c0_3 = arith.constant 0 : index
    %c0_4 = arith.constant 0 : index
    %3 = vector.load %arg4[%c0_3, %c0_4] : memref<128x128xf32, #tpu.memory_space<vmem>>, vector<128x128xf32>
    tpu.vector_store %arg4[%c0_3, %c0_4], %2 {strides = array<i32>} : memref<128x128xf32, #tpu.memory_space<vmem>>, vector<128x128xf32>,
    return
  }
  func.func @transform_0(%arg0: i32, %arg1: i32) -> (i32, i32) {
    %c0_i32 = arith.constant 0 : i32
    %c0_i32_0 = arith.constant 0 : i32
    return %arg0, %c0_i32 : i32, i32
  }
  func.func @transform_1(%arg0: i32, %arg1: i32) -> (i32, i32) {
    %c0_i32 = arith.constant 0 : i32
    %c0_i32_0 = arith.constant 0 : i32
    return %arg1, %c0_i32 : i32, i32
  }
  func.func @transform_2(%arg0: i32, %arg1: i32) -> (i32, i32) {
    %c0_i32 = arith.constant 0 : i32
    return %arg0, %arg1 : i32, i32
  }
}

</mosaic_0001>

<bundles_post_ra>
// kernel: tpu_custom_call.1
= control target key start
LH: loop header
LB: loop body
LE: loop exit
PB: predicated region body
PF: predicated region fallthrough
CT: control target
= control target key end

     0   :  { %vm125_vm0 = vcmask 261120   ;;  %s560_s0 = inlined_call_operand.vmem [shape: bf16[128,32], index: 0, kind: input, shape index: {}]   ;;  %s561_s1 = inlined_call_operand.vmem [shape: bf16[128,32], index: 1, kind: input, shape index: {}]   ;;  %s562_s2 = inlined_call_operand.hbm [shape: f32[128,128], index: 2, kind: output, shape index: {}]  }
   0x1   :  { %v410_v0 = vld [vmem:[%s561_s1] sm:$0xff]   ;;  %v411_v1 = vld [vmem:[%s561_s1 + $0x8] sm:$0xff]   ;;  %v412_v3 = vld [vmem:[%s561_s1 + $0x10] sm:$0xff]  }
   0x2   :  { %391 = vmatprep.subr.msk.bf16.mxu0 %vm125_vm0, %v410_v0  ;;  %392 = vmatprep.subr.msk.bf16.mxu1 %vm125_vm0, %v410_v0  ;;  %v151_v2 = vsel %vm125_vm0, %v410_v0, 0  ;;  %v154_v4 = vsel %vm125_vm0, %v411_v1, 0  ;;  %v418_v5 = vld [vmem:[%s560_s0] sm:$0xff]   ;;  %v157_v7 = vsel %vm125_vm0, %v412_v3, 0  ;;  %v413_v8 = vld [vmem:[%s561_s1 + $0x18] sm:$0xff]  }
   0x3   :  { %344 = vmatpush3.bf16.xpose.msra.mxu0 %v151_v2  ;;  %383 = vmatpush3.bf16.xpose.msra.mxu1 %v151_v2  ;;  %v419_v6 = vld [vmem:[%s560_s0 + $0x20] sm:$0xff]  }
   0x4   :  { %393 = vmatprep.subr.msk.bf16.mxu0 %vm125_vm0, %v411_v1  ;;  %394 = vmatprep.subr.msk.bf16.mxu1 %vm125_vm0, %v411_v1 }
   0x5   :  { %359 = vmatprep.mubr.msk.bf16.mxu0 %vm125_vm0, %v418_v5  ;;  %367 = vmatprep.mubr.msk.bf16.mxu1 %vm125_vm0, %v419_v6 }
   0xb   :  { %346 = vmatpush3.bf16.xpose.msra.mxu0 %v154_v4  ;;  %384 = vmatpush3.bf16.xpose.msra.mxu1 %v154_v4 }
   0xc   :  { %395 = vmatprep.subr.msk.bf16.mxu0 %vm125_vm0, %v412_v3  ;;  %396 = vmatprep.subr.msk.bf16.mxu1 %vm125_vm0, %v412_v3 }
   0xd   :  { %7 = vsyncpa [#allocation3], 0  ;;  %v160_v9 = vsel %vm125_vm0, %v413_v8, 0  ;;  %v414_v10 = vld [vmem:[%s561_s1 + $0x20] sm:$0xff]   ;;  %v415_v12 = vld [vmem:[%s561_s1 + $0x28] sm:$0xff]  }
   0xe   :  { %v163_v11 = vsel %vm125_vm0, %v414_v10, 0  ;;  %v166_v13 = vsel %vm125_vm0, %v415_v12, 0  ;;  %v416_v14 = vld [vmem:[%s561_s1 + $0x30] sm:$0xff]   ;;  %v417_v16 = vld [vmem:[%s561_s1 + $0x38] sm:$0xff]   ;;  %v420_v18 = vld [vmem:[%s560_s0 + $0x8] sm:$0xff]  }
   0xf   :  { %v169_v15 = vsel %vm125_vm0, %v416_v14, 0  ;;  %v172_v17 = vsel %vm125_vm0, %v417_v16, 0  ;;  %v421_v19 = vld [vmem:[%s560_s0 + $0x28] sm:$0xff]   ;;  %v422_v20 = vld [vmem:[%s560_s0 + $0x10] sm:$0xff]   ;;  %v424_v22 = vld [vmem:[%s560_s0 + $0x18] sm:$0xff]  }
  0x10   :  { %v423_v21 = vld [vmem:[%s560_s0 + $0x30] sm:$0xff]   ;;  %v425_v23 = vld [vmem:[%s560_s0 + $0x38] sm:$0xff]   ;;  %s450_s0 = smov [#allocation2]  }
  0x11   :  { %s292_s12 = sshll.u32 %s450_s0, 4  ;;  %s293_s12 = int_to_ptr.vmem [resolvable:$true] %s292_s12 }
  0x12   :  { %s426_s13 = scalar_lea.vmem %s293_s12, 2048  ;;  %p431_p1 = scmp.lt.s32.totalorder %s293_s12, %s293_s12 }
  0x13   :  { %348 = vmatpush3.bf16.xpose.msra.mxu0 %v157_v7  ;;  %385 = vmatpush3.bf16.xpose.msra.mxu1 %v157_v7  ;;  %p427_p0 = scmp.ne.s32.totalorder %s293_s12, %s426_s13  ;;  %p432_p2 = scmp.lt.s32.totalorder %s426_s13, %s426_s13 }
  0x14   :  { %397 = vmatprep.subr.msk.bf16.mxu0 %vm125_vm0, %v413_v8  ;;  %398 = vmatprep.subr.msk.bf16.mxu1 %vm125_vm0, %v413_v8 }
  0x15   :  { %p433_p3 = por %p432_p2, %p431_p1 }
  0x17   :  { %p434_p4 = pnand %p433_p3, %p427_p0 }
  0x1b   :  { %350 = vmatpush3.bf16.xpose.msra.mxu0 %v160_v9  ;;  %386 = vmatpush3.bf16.xpose.msra.mxu1 %v160_v9 }
  0x1c   :  { %399 = vmatprep.subr.msk.bf16.mxu0 %vm125_vm0, %v414_v10  ;;  %400 = vmatprep.subr.msk.bf16.mxu1 %vm125_vm0, %v414_v10 }
  0x23   :  { %352 = vmatpush3.bf16.xpose.msra.mxu0 %v163_v11  ;;  %387 = vmatpush3.bf16.xpose.msra.mxu1 %v163_v11 }
  0x24   :  { %401 = vmatprep.subr.msk.bf16.mxu0 %vm125_vm0, %v415_v12  ;;  %402 = vmatprep.subr.msk.bf16.mxu1 %vm125_vm0, %v415_v12 }
  0x2b   :  { %354 = vmatpush3.bf16.xpose.msra.mxu0 %v166_v13  ;;  %388 = vmatpush3.bf16.xpose.msra.mxu1 %v166_v13 }
  0x2c   :  { %403 = vmatprep.subr.msk.bf16.mxu0 %vm125_vm0, %v416_v14  ;;  %404 = vmatprep.subr.msk.bf16.mxu1 %vm125_vm0, %v416_v14 }
  0x33   :  { %356 = vmatpush3.bf16.xpose.msra.mxu0 %v169_v15  ;;  %389 = vmatpush3.bf16.xpose.msra.mxu1 %v169_v15 }
  0x34   :  { %405 = vmatprep.subr.msk.bf16.mxu0 %vm125_vm0, %v417_v16  ;;  %406 = vmatprep.subr.msk.bf16.mxu1 %vm125_vm0, %v417_v16 }
  0x3b   :  { %358 = vmatpush3.bf16.xpose.msra.mxu0 %v172_v17  ;;  %390 = vmatpush3.bf16.xpose.msra.mxu1 %v172_v17 }
  0x42   :  { %360 = vmatmul.mubr.msk.bf16.vlgmr.msra.gmra.mrb[0].mxu0 %vm125_vm0, %v420_v18  ;;  %368 = vmatmul.mubr.msk.bf16.vlgmr.msra.gmra.mrb[0].mxu1 %vm125_vm0, %v421_v19 }
  0x43   :  { %363 = vmatprep.mubr.msk.bf16.mxu0 %vm125_vm0, %v422_v20  ;;  %371 = vmatprep.mubr.msk.bf16.mxu1 %vm125_vm0, %v423_v21 }
  0x4a   :  { %364 = vmatmul.mubr.msk.bf16.gmra.mrb[4].mxu0 %vm125_vm0, %v424_v22  ;;  %372 = vmatmul.mubr.msk.bf16.gmra.mrb[4].mxu1 %vm125_vm0, %v425_v23 }
 0x115   :  { %v361_v24 = vpop.f32.mrb[0].mxu0  ;;  %v369_v25 = vpop.f32.mrb[0].mxu1 }
 0x116   :  { %273 = vst [vmem:[#allocation2 + $0x10] sm:$0xff] %v361_v24  ;;  %281 = vst [vmem:[#allocation2 + $0x50] sm:$0xff] %v369_v25  ;;  %v208_v26 = vpop.f32.mrb[1].mxu0  ;;  %v240_v27 = vpop.f32.mrb[1].mxu1 }
 0x117   :  { %271 = vst [vmem:[#allocation2] sm:$0xff] %v208_v26  ;;  %279 = vst [vmem:[#allocation2 + $0x40] sm:$0xff] %v240_v27  ;;  %v362_v28 = vpop.f32.mrb[2].mxu0  ;;  %v370_v29 = vpop.f32.mrb[2].mxu1 }
 0x118   :  { %274 = vst [vmem:[#allocation2 + $0x18] sm:$0xff] %v362_v28  ;;  %282 = vst [vmem:[#allocation2 + $0x58] sm:$0xff] %v370_v29  ;;  %v211_v30 = vpop.f32.mrb[3].mxu0  ;;  %v243_v31 = vpop.f32.mrb[3].mxu1 }
 0x119   :  { %272 = vst [vmem:[#allocation2 + $0x8] sm:$0xff] %v211_v30  ;;  %280 = vst [vmem:[#allocation2 + $0x48] sm:$0xff] %v243_v31 }
 0x11d   :  { %v365_v32 = vpop.f32.mrb[4].mxu0  ;;  %v373_v33 = vpop.f32.mrb[4].mxu1 }
 0x11e   :  { %277 = vst [vmem:[#allocation2 + $0x30] sm:$0xff] %v365_v32  ;;  %285 = vst [vmem:[#allocation2 + $0x70] sm:$0xff] %v373_v33  ;;  %v224_v34 = vpop.f32.mrb[5].mxu0  ;;  %v256_v35 = vpop.f32.mrb[5].mxu1 }
 0x11f   :  { %275 = vst [vmem:[#allocation2 + $0x20] sm:$0xff] %v224_v34  ;;  %283 = vst [vmem:[#allocation2 + $0x60] sm:$0xff] %v256_v35  ;;  %v366_v36 = vpop.f32.mrb[6].mxu0  ;;  %v374_v37 = vpop.f32.mrb[6].mxu1 }
 0x120   :  { %278 = vst [vmem:[#allocation2 + $0x38] sm:$0xff] %v366_v36  ;;  %286 = vst [vmem:[#allocation2 + $0x78] sm:$0xff] %v374_v37  ;;  %v227_v38 = vpop.f32.mrb[7].mxu0  ;;  %v259_v39 = vpop.f32.mrb[7].mxu1 }
 0x121   :  { %276 = vst [vmem:[#allocation2 + $0x28] sm:$0xff] %v227_v38  ;;  %284 = vst [vmem:[#allocation2 + $0x68] sm:$0xff] %v259_v39 }
 0x122   :  { %437 = shalt.err (!%p434_p4)
}
 0x123   :  { %s438_s16 = scalar_lea.hbm %s562_s2, 2048 }
 0x124   :  { %p439_p5 = scmp.ne.s32.totalorder %s562_s2, %s438_s16  ;;  %p442_p6 = scmp.lt.u32.totalorder %s438_s16, %s562_s2 }
 0x126   :  { %p444_p7 = pnand %p442_p6, %p439_p5 }
 0x128   :  { %447 = shalt.err (!%p444_p7)
}
 0x129   :  { %s451_s21 = smov 128   ;;  %s452_s22 = smov 8  }
 0x12a   :  { %298 = dma.vmem_to_hbm [thread:$0]  %s293_s12, 2048, %s562_s2, [#allocation3], %s451_s21, %s451_s21, %s452_s22  }
 0x12b   :  { %448 = dma.done.wait [#allocation3], 2048  }
 0x12c   :  { %449 = vsyncadd [#allocation3], 4294965248 }
 0x12d   :  { %302 = vsyncpa [#allocation3], 1 }

</bundles_post_ra>
